<compile_context>
chip_gen: v5e
topology: v5e:2x2
jax: 0.10.0
libtpu: 0.0.40
codegen_flags: <defaults>
</compile_context>

<pallas_src>
import functools
import math

import jax
import jax.numpy as jnp
import numpy as np
from jax.experimental import pallas as pl
from jax.experimental.pallas import tpu as pltpu

BN_EPS = 1e-5


# -----------------------------------------------------------------------------
# FullyConnected block = 1x1 Conv2D (pointwise linear over features)
#                        + BatchNorm2d (training-mode batch stats)
#                        + ReLU,
# executed channel-major on (Cin, M) / (Cout, M) slabs, tiled over M.
# -----------------------------------------------------------------------------

def _fc_stats_kernel(x_ref, w_ref, sum_ref, sq_ref):
    """Pass 1: per-output-channel sum / sum-of-squares of the conv output.

    x_ref: (Cin, TM) tile, w_ref: (Cout, Cin); sum/sq accumulators (Cout, 1) stay
    resident across the (arbitrary) M grid axis.
    """
    y = jnp.dot(w_ref[...], x_ref[...], preferred_element_type=jnp.float32)

    @pl.when(pl.program_id(0) == 0)
    def _init():
        sum_ref[...] = jnp.zeros_like(sum_ref)
        sq_ref[...] = jnp.zeros_like(sq_ref)

    sum_ref[...] += jnp.sum(y, axis=1, keepdims=True)
    sq_ref[...] += jnp.sum(y * y, axis=1, keepdims=True)


def _fc_apply_kernel(x_ref, w_ref, ss_ref, o_ref):
    """Pass 2: o = relu((W @ x) * scale + shift) — BN folded into one multiply-add.

    ss_ref: (Cout, 2) with column 0 = scale, column 1 = shift.
    """
    y = jnp.dot(w_ref[...], x_ref[...], preferred_element_type=jnp.float32)
    y = y * ss_ref[:, 0:1] + ss_ref[:, 1:2]
    o_ref[...] = jnp.maximum(y, 0.0).astype(o_ref.dtype)  # f.relu


def _pick_tile_m(m, max_tile):
    """Largest multiple-of-128 divisor of m that is <= max_tile (fallback: whole m)."""
    best = None
    for t in range(128, max_tile + 1, 128):
        if m % t == 0:
            best = t
    return best if best is not None else m


def fc_forward(x_t, w, gamma, beta, tile_m):
    """1x1 conv + training-mode BN + ReLU on a channel-major slab.

    x_t: (Cin, M), w: (Cout, Cin), gamma/beta: (Cout, 1). Returns (Cout, M) float32.
    The conv bias is omitted: BN subtracts the batch mean, so it cancels exactly.
    """
    cin, m = x_t.shape
    cout = w.shape[0]
    assert m % tile_m == 0
    grid = (m // tile_m,)

    x_spec = pl.BlockSpec((cin, tile_m), lambda i: (0, i))
    w_spec = pl.BlockSpec((cout, cin), lambda i: (0, 0))
    vec_spec = pl.BlockSpec((cout, 1), lambda i: (0, 0))

    # ---- Pass 1: per-channel sum / sumsq (single sweep, accumulated across M tiles).
    sums, sqsums = pl.pallas_call(
        _fc_stats_kernel,
        out_shape=(jax.ShapeDtypeStruct((cout, 1), jnp.float32),
                   jax.ShapeDtypeStruct((cout, 1), jnp.float32)),
        grid=grid,
        in_specs=[x_spec, w_spec],
        out_specs=(vec_spec, vec_spec),
        compiler_params=pltpu.CompilerParams(dimension_semantics=("arbitrary",)),
    )(x_t, w)

    # ---- Fold BN into one per-channel scale/shift (tiny (Cout,1) host-side math).
    mean = sums / m
    var = jnp.maximum(sqsums / m - mean * mean, 0.0)   # biased batch variance
    scale = gamma * jax.lax.rsqrt(var + BN_EPS)
    shift = beta - mean * scale
    ss = jnp.concatenate([scale, shift], axis=1)       # (Cout, 2)

    # ---- Pass 2: recompute the (cheap, tiny-K) matmul and apply scale/shift + ReLU.
    # Recomputing avoids an HBM round-trip of the raw pre-BN activation.
    out = pl.pallas_call(
        _fc_apply_kernel,
        out_shape=jax.ShapeDtypeStruct((cout, m), jnp.float32),
        grid=grid,
        in_specs=[x_spec, w_spec, pl.BlockSpec((cout, 2), lambda i: (0, 0))],
        out_specs=pl.BlockSpec((cout, tile_m), lambda i: (0, i)),
        compiler_params=pltpu.CompilerParams(dimension_semantics=("parallel",)),
    )(x_t, w, ss)
    return out


# -----------------------------------------------------------------------------
# Multi-head spatial attention: per (batch, head), softmax over the node axis.
# -----------------------------------------------------------------------------

def _mha_kernel(q_ref, k_ref, v_ref, o_ref, *, sm_scale):
    # Refs are (L, N, dh) for one (batch, head) pair (leading grid dim squeezed).
    q = q_ref[...]
    k = k_ref[...]
    v = v_ref[...]
    s = jnp.einsum('lnd,lmd->lnm', q, k) * sm_scale           # (L, N, N)
    s = s - jnp.max(s, axis=-1, keepdims=True)
    p = jnp.exp(s)
    p = p / jnp.sum(p, axis=-1, keepdims=True)                # softmax over key nodes
    o_ref[...] = jnp.einsum('lnm,lmd->lnd', p, v).astype(o_ref.dtype)


def mha_forward(q, k, v, sm_scale):
    """q, k, v: (B*H, L, N, dh) -> attention output of the same shape."""
    bh, seq_len, n_nodes, d_head = q.shape
    spec = pl.BlockSpec((None, seq_len, n_nodes, d_head), lambda i: (i, 0, 0, 0))
    return pl.pallas_call(
        functools.partial(_mha_kernel, sm_scale=sm_scale),
        out_shape=jax.ShapeDtypeStruct((bh, seq_len, n_nodes, d_head), jnp.float32),
        grid=(bh,),
        in_specs=[spec, spec, spec],
        out_specs=spec,
        compiler_params=pltpu.CompilerParams(dimension_semantics=("parallel",)),
    )(q, k, v)


# -----------------------------------------------------------------------------
# SpatialAttention module
# -----------------------------------------------------------------------------

def _xavier_uniform(key, cin, cout):
    # torch.nn.init.xavier_uniform_ on a (cout, cin, 1, 1) conv weight.
    bound = math.sqrt(6.0 / (cin + cout))
    return jax.random.uniform(key, (cout, cin), minval=-bound, maxval=bound,
                              dtype=jnp.float32)


class SpatialAttentionPallas:
    """Pallas equivalent of GMAN SpatialAttention (training-mode BN forward)."""

    def __init__(self, key, d_hidden, n_heads, max_tile_m=1024):
        assert d_hidden % n_heads == 0, "Hidden size not divisible by number of heads."
        self.d_hidden = d_hidden
        self.n_heads = n_heads
        self.d_head = d_hidden // n_heads
        self.max_tile_m = max_tile_m

        kq, kk, kv, ko = jax.random.split(key, 4)
        wq = _xavier_uniform(kq, 2 * d_hidden, d_hidden)   # (D, 2D)
        wk = _xavier_uniform(kk, 2 * d_hidden, d_hidden)
        wv = _xavier_uniform(kv, 2 * d_hidden, d_hidden)
        # Q/K/V fused into one stacked weight; per-channel BN stats stay independent.
        self.w_qkv = jnp.concatenate([wq, wk, wv], axis=0)  # (3D, 2D)
        self.gamma_qkv = jnp.ones((3 * d_hidden, 1), jnp.float32)
        self.beta_qkv = jnp.zeros((3 * d_hidden, 1), jnp.float32)

        self.w_out = _xavier_uniform(ko, d_hidden, d_hidden)  # (D, D)
        self.gamma_out = jnp.ones((d_hidden, 1), jnp.float32)
        self.beta_out = jnp.zeros((d_hidden, 1), jnp.float32)
        # NOTE: conv biases intentionally omitted (zero-init in PyTorch AND cancelled
        # exactly by training-mode BatchNorm).

    def __call__(self, x, ste):
        assert x.shape == ste.shape
        b, l, n, d = x.shape
        assert d == self.d_hidden
        h, dh = self.n_heads, self.d_head
        m = b * l * n
        tile_m = _pick_tile_m(m, self.max_tile_m)

        # Channel-major, lane-dense layout: features on sublanes, M = B*L*N on lanes.
        xs = jnp.concatenate([x, ste], axis=-1).reshape(m, 2 * d).astype(jnp.float32)
        xs_t = xs.T                                            # (2D, M)

        # Fused Q/K/V FC (1x1 conv + BN + ReLU) -> (3D, M)
        qkv_t = fc_forward(xs_t, self.w_qkv, self.gamma_qkv, self.beta_qkv, tile_m)

        # Split heads: (3D, M) -> (3, B*H, L, N, dh)
        qkv = qkv_t.reshape(3, h, dh, b, l, n).transpose(0, 3, 1, 4, 5, 2)
        qkv = qkv.reshape(3, b * h, l, n, dh)
        att = mha_forward(qkv[0], qkv[1], qkv[2], 1.0 / math.sqrt(dh))  # (B*H, L, N, dh)

        # Merge heads back into the channel-major layout (feature index = h*dh + d).
        att_t = att.reshape(b, h, l, n, dh).transpose(1, 4, 0, 2, 3).reshape(d, m)

        # Output FC (1x1 conv + BN + ReLU) -> (D, M), then back to (B, L, N, D).
        out_t = fc_forward(att_t, self.w_out, self.gamma_out, self.beta_out, tile_m)
        return out_t.T.reshape(b, l, n, d)


# -----------------------------------------------------------------------------
# Pure-JAX reference (mirrors the PyTorch forward) for a sanity check.
# -----------------------------------------------------------------------------

def _reference_forward(model, x, ste):
    d = model.d_hidden
    h, dh = model.n_heads, model.d_head
    hi = jax.lax.Precision.HIGHEST

    def fc(inp, w, gamma, beta):
        y = jnp.einsum('blnc,oc->blno', inp, w, precision=hi)
        mean = jnp.mean(y, axis=(0, 1, 2), keepdims=True)
        var = jnp.var(y, axis=(0, 1, 2), keepdims=True)        # biased, like BN training
        y = (y - mean) / jnp.sqrt(var + BN_EPS)
        y = y * gamma.reshape(1, 1, 1, -1) + beta.reshape(1, 1, 1, -1)
        return jnp.maximum(y, 0.0)

    xs = jnp.concatenate([x, ste], axis=-1)
    q = fc(xs, model.w_qkv[:d], model.gamma_qkv[:d], model.beta_qkv[:d])
    k = fc(xs, model.w_qkv[d:2 * d], model.gamma_qkv[d:2 * d], model.beta_qkv[d:2 * d])
    v = fc(xs, model.w_qkv[2 * d:], model.gamma_qkv[2 * d:], model.beta_qkv[2 * d:])

    q = jnp.concatenate(jnp.split(q, h, axis=-1), axis=0)      # (H*B, L, N, dh)
    k = jnp.concatenate(jnp.split(k, h, axis=-1), axis=0)
    v = jnp.concatenate(jnp.split(v, h, axis=-1), axis=0)
    scores = jnp.einsum('blnd,blmd->blnm', q, k, precision=hi) / (dh ** 0.5)
    p = jax.nn.softmax(scores, axis=-1)
    att = jnp.einsum('blnm,blmd->blnd', p, v, precision=hi)
    att = jnp.concatenate(jnp.split(att, h, axis=0), axis=-1)  # (B, L, N, D)
    return fc(att, model.w_out, model.gamma_out, model.beta_out)


if __name__ == "__main__":
    key = jax.random.PRNGKey(0)
    k_x, k_ste, k_params = jax.random.split(key, 3)

    # Small shapes consistent with the module: (batch, seq_len, n_nodes, d_hidden).
    batch, seq_len, n_nodes = 2, 8, 16
    d_hidden, n_heads = 32, 4
    x = jax.random.normal(k_x, (batch, seq_len, n_nodes, d_hidden), dtype=jnp.float32)
    ste = jax.random.normal(k_ste, (batch, seq_len, n_nodes, d_hidden), dtype=jnp.float32)

    # max_tile_m=128 so the toy M=256 exercises the multi-tile BN-stats accumulation;
    # production M (~1e5+) would use the default 512-1024 tiles.
    model = SpatialAttentionPallas(k_params, d_hidden, n_heads, max_tile_m=128)

    out = model(x, ste)
    out = jax.block_until_ready(out)
    assert out.shape == (batch, seq_len, n_nodes, d_hidden)
    assert bool(jnp.all(jnp.isfinite(out)))

    # Sanity check vs. a pure-JAX reference (loose tolerance to allow for MXU f32
    # pass-accumulation differences vs. XLA's highest-precision dots).
    ref = _reference_forward(model, x, ste)
    np.testing.assert_allclose(np.asarray(out), np.asarray(ref), rtol=5e-2, atol=5e-2)

    print("KERNEL_OK")
</pallas_src>

<mosaic_0001>
module attributes {stable_mosaic.version = 11 : i64} {
  func.func @_fc_stats_kernel(%arg0: i32, %arg1: memref<64x128xf32, #tpu.memory_space<vmem>>, %arg2: memref<96x64xf32, #tpu.memory_space<vmem>>, %arg3: memref<96x1xf32, #tpu.memory_space<vmem>>, %arg4: memref<96x1xf32, #tpu.memory_space<vmem>>) attributes {dimension_semantics = [#tpu.dimension_semantics<arbitrary>], iteration_bounds = array<i64: 2>, scalar_prefetch = 0 : i64, scratch_operands = 0 : i64, tpu.core_type = #tpu.core_type<tc>, window_params = [{transform_indices = @transform_0, window_bounds = array<i64: 64, 128>}, {pipeline_mode = #tpu.pipeline_mode<synchronous>, transform_indices = @transform_1, window_bounds = array<i64: 96, 64>}, {pipeline_mode = #tpu.pipeline_mode<synchronous>, transform_indices = @transform_2, window_bounds = array<i64: 96, 1>}, {pipeline_mode = #tpu.pipeline_mode<synchronous>, transform_indices = @transform_3, window_bounds = array<i64: 96, 1>}]} {
    %c0 = arith.constant 0 : index
    %c0_0 = arith.constant 0 : index
    %0 = vector.load %arg2[%c0, %c0_0] : memref<96x64xf32, #tpu.memory_space<vmem>>, vector<96x64xf32>
    %c0_1 = arith.constant 0 : index
    %c0_2 = arith.constant 0 : index
    %1 = vector.load %arg1[%c0_1, %c0_2] : memref<64x128xf32, #tpu.memory_space<vmem>>, vector<64x128xf32>
    %cst = arith.constant dense<0.000000e+00> : vector<96x128xf32>
    %2 = tpu.matmul %0, %1, %cst {dimension_numbers = #tpu.dot_dimension_numbers<[1], [0], [0], [1], [0, 0, 1, 1], [], []>} : vector<96x64xf32>, vector<64x128xf32>, vector<96x128xf32> -> vector<96x128xf32>
    %c0_i32 = arith.constant 0 : i32
    %3 = arith.cmpi eq, %arg0, %c0_i32 : i32
    %4 = arith.extui %3 : i1 to i32
    %c0_i32_3 = arith.constant 0 : i32
    %5 = arith.cmpi ne, %4, %c0_i32_3 : i32
    scf.if %5 {
      %cst_14 = arith.constant 0.000000e+00 : f32
      %17 = vector.broadcast %cst_14 : f32 to vector<96x1xf32>
      %c0_15 = arith.constant 0 : index
      %c0_16 = arith.constant 0 : index
      %18 = vector.load %arg3[%c0_15, %c0_16] : memref<96x1xf32, #tpu.memory_space<vmem>>, vector<96x1xf32>
      tpu.vector_store %arg3[%c0_15, %c0_16], %17 {strides = array<i32>} : memref<96x1xf32, #tpu.memory_space<vmem>>, vector<96x1xf32>,
      %cst_17 = arith.constant 0.000000e+00 : f32
      %19 = vector.broadcast %cst_17 : f32 to vector<96x1xf32>
      %c0_18 = arith.constant 0 : index
      %c0_19 = arith.constant 0 : index
      %20 = vector.load %arg4[%c0_18, %c0_19] : memref<96x1xf32, #tpu.memory_space<vmem>>, vector<96x1xf32>
      tpu.vector_store %arg4[%c0_18, %c0_19], %19 {strides = array<i32>} : memref<96x1xf32, #tpu.memory_space<vmem>>, vector<96x1xf32>,
    } else {
    }
    %c0_4 = arith.constant 0 : index
    %c0_5 = arith.constant 0 : index
    %6 = vector.load %arg3[%c0_4, %c0_5] : memref<96x1xf32, #tpu.memory_space<vmem>>, vector<96x1xf32>
    %cst_6 = arith.constant dense<0.000000e+00> : vector<96xf32>
    %7 = vector.multi_reduction <add>, %2, %cst_6 [1] : vector<96x128xf32> to vector<96xf32>
    %8 = vector.shape_cast %7 : vector<96xf32> to vector<96x1xf32>
    %9 = arith.addf %6, %8 : vector<96x1xf32>
    %c0_7 = arith.constant 0 : index
    %c0_8 = arith.constant 0 : index
    %10 = vector.load %arg3[%c0_7, %c0_8] : memref<96x1xf32, #tpu.memory_space<vmem>>, vector<96x1xf32>
    tpu.vector_store %arg3[%c0_7, %c0_8], %9 {strides = array<i32>} : memref<96x1xf32, #tpu.memory_space<vmem>>, vector<96x1xf32>,
    %c0_9 = arith.constant 0 : index
    %c0_10 = arith.constant 0 : index
    %11 = vector.load %arg4[%c0_9, %c0_10] : memref<96x1xf32, #tpu.memory_space<vmem>>, vector<96x1xf32>
    %12 = arith.mulf %2, %2 : vector<96x128xf32>
    %cst_11 = arith.constant dense<0.000000e+00> : vector<96xf32>
    %13 = vector.multi_reduction <add>, %12, %cst_11 [1] : vector<96x128xf32> to vector<96xf32>
    %14 = vector.shape_cast %13 : vector<96xf32> to vector<96x1xf32>
    %15 = arith.addf %11, %14 : vector<96x1xf32>
    %c0_12 = arith.constant 0 : index
    %c0_13 = arith.constant 0 : index
    %16 = vector.load %arg4[%c0_12, %c0_13] : memref<96x1xf32, #tpu.memory_space<vmem>>, vector<96x1xf32>
    tpu.vector_store %arg4[%c0_12, %c0_13], %15 {strides = array<i32>} : memref<96x1xf32, #tpu.memory_space<vmem>>, vector<96x1xf32>,
    return
  }
  func.func @transform_0(%arg0: i32) -> (i32, i32) {
    %c0_i32 = arith.constant 0 : i32
    %c0_i32_0 = arith.constant 0 : i32
    return %c0_i32, %arg0 : i32, i32
  }
  func.func @transform_1(%arg0: i32) -> (i32, i32) {
    %c0_i32 = arith.constant 0 : i32
    %c0_i32_0 = arith.constant 0 : i32
    %c0_i32_1 = arith.constant 0 : i32
    return %c0_i32, %c0_i32_0 : i32, i32
  }
  func.func @transform_2(%arg0: i32) -> (i32, i32) {
    %c0_i32 = arith.constant 0 : i32
    %c0_i32_0 = arith.constant 0 : i32
    %c0_i32_1 = arith.constant 0 : i32
    return %c0_i32, %c0_i32_0 : i32, i32
  }
  func.func @transform_3(%arg0: i32) -> (i32, i32) {
    %c0_i32 = arith.constant 0 : i32
    %c0_i32_0 = arith.constant 0 : i32
    %c0_i32_1 = arith.constant 0 : i32
    return %c0_i32, %c0_i32_0 : i32, i32
  }
}

</mosaic_0001>

<bundles_post_ra>
// kernel: tpu_custom_call.1
= control target key start
LH: loop header
LB: loop body
LE: loop exit
PB: predicated region body
PF: predicated region fallthrough
CT: control target
= control target key end

     0   :  { %s645_s12 = smov 0   ;;  %s647_s13 = smov 0   ;;  %s1021_s0 = inlined_call_operand.vmem [shape: f32[64,256], index: 0, kind: input, shape index: {}]   ;;  %s1022_s1 = inlined_call_operand.vmem [shape: f32[96,64], index: 1, kind: input, shape index: {}]   ;;  %s1023_s2 = inlined_call_operand.vmem [shape: f32[96,1], index: 2, kind: output, shape index: {0}]   ;;  %s1024_s3 = inlined_call_operand.vmem [shape: f32[96,1], index: 3, kind: output, shape index: {1}]  }
   0x1   :  { %s649_s14 = smov 0  }
   0x2 LB: > { %s529_s15 = sadd.s32 4294967295, %s622_s14   ;;  %s662_s16 = sadd.s32 1, %s622_s14   ;;  %s622_s14 = sphi %s649_s14, %s1027_s14   ;;  %s618_s13 = sphi %s647_s13, %s1026_s13   ;;  %s614_s12 = sphi %s645_s12, %s1025_s12  }
   0x3   : > { %s18_s17 = ssub.s32 %s622_s14, %s662_s16  ;;  %s21_s18 = sadd.s32 1, %s618_s13 }
   0x4   : > { %p19_p0 = scmp.eq.s32.totalorder %s18_s17, 0  ;;  %p28_p1 = scmp.ne.s32.totalorder %s618_s13, %s614_s12 }
   0x5   : > { %p29_p2 = scmp.eq.s32.totalorder %s622_s14, 0  ;;  %p531_p4 = scmp.ge.s32.totalorder %s622_s14, 2 }
   0x6   : > { %s671_s19 = scalar_select %p19_p0, %s618_s13, %s21_s18  }
   0x7   : > { %p30_p3 = por %p29_p2, %p28_p1  ;;  %120 = sbr.rel (%p531_p4) target bundleno = 24 (0x18), region = 20 }
   0xc   : > { %123 = sbr.rel (!%p30_p3) target bundleno = 24 (0x18), region = 24  ;;  %s125_s20 = sand.u32 (%p30_p3), 1, %s618_s13  }
   0xd   : > { %s533_s21 = sshll.u32 (%p30_p3), %s622_s14, 3  ;;  %s532_s22 = sshll.u32 (%p30_p3), %s125_s20, 6 }
   0xe   : > { %s129_s25 = scalar_lea.vmem (%p30_p3), %s1021_s0, %s533_s21  ;;  %s127_s26 = scalar_lea.vmem (%p30_p3), [#allocation2], %s532_s22 }
   0xf   : > { %v172_v0 = vld [vmem:[%s129_s25] sm:$0xff] (%p30_p3)  ;;  %v174_v1 = vld [vmem:[%s129_s25 + $0x10] sm:$0xff] (%p30_p3) }
  0x10   : > { %v176_v2 = vld [vmem:[%s129_s25 + $0x20] sm:$0xff] (%p30_p3)  ;;  %173 = vst [vmem:[%s127_s26] sm:$0xff] (%p30_p3), %v172_v0  ;;  %v178_v3 = vld [vmem:[%s129_s25 + $0x30] sm:$0xff] (%p30_p3) }
  0x11   : > { %175 = vst [vmem:[%s127_s26 + $0x8] sm:$0xff] %v174_v1  ;;  %v180_v4 = vld [vmem:[%s129_s25 + $0x40] sm:$0xff]  ;;  %v182_v5 = vld [vmem:[%s129_s25 + $0x50] sm:$0xff] }
  0x12   : > { %177 = vst [vmem:[%s127_s26 + $0x10] sm:$0xff] %v176_v2  ;;  %v184_v6 = vld [vmem:[%s129_s25 + $0x60] sm:$0xff]  ;;  %v186_v7 = vld [vmem:[%s129_s25 + $0x70] sm:$0xff] }
  0x13   : > { %179 = vst [vmem:[%s127_s26 + $0x18] sm:$0xff] %v178_v3 }
  0x14   : > { %181 = vst [vmem:[%s127_s26 + $0x20] sm:$0xff] %v180_v4 }
  0x15   : > { %183 = vst [vmem:[%s127_s26 + $0x28] sm:$0xff] %v182_v5 }
  0x16   : > { %185 = vst [vmem:[%s127_s26 + $0x30] sm:$0xff] %v184_v6 }
  0x17   : > { %187 = vst [vmem:[%s127_s26 + $0x38] sm:$0xff] %v186_v7 }
  0x18 PF: > { %p534_p5 = scmp.ge.s32.totalorder %s622_s14, 1  ;;  %p192_p6 = scmp.lt.s32.totalorder %s622_s14, 3 }
  0x1a   : > { %p193_p7 = pnand %p534_p5, %p192_p6 }
  0x1b   : > { %s199_s27 = sand.u32 (!%p193_p7), 1, %s614_s12   ;;  %p548_p8 = scmp.ne.s32.totalorder (!%p193_p7), %s529_s15, 0 }
  0x1c   : > { %196 = sbr.rel (%p193_p7) target bundleno = 399 (0x18f), region = 62  ;;  %s535_s28 = sshll.u32 (!%p193_p7), %s199_s27, 6 }
  0x1d   : > { %s201_s29 = scalar_lea.vmem (!%p193_p7), [#allocation2], %s535_s28 }
  0x21   : > { %v236_v8 = vld [vmem:[%s201_s29 + $0x38] sm:$0xff]  ;;  %v235_v9 = vld [vmem:[%s201_s29 + $0x30] sm:$0xff]  ;;  %v234_v10 = vld [vmem:[%s201_s29 + $0x28] sm:$0xff]  ;;  %vm237_vm0 = vcmask 523264  }
  0x22   : > { %552 = vmatpush.msra.mxu2 %v236_v8  ;;  %553 = vmatpush.msra.mxu3 %v236_v8  ;;  %v233_v11 = vld [vmem:[%s201_s29 + $0x20] sm:$0xff]  ;;  %v232_v12 = vld [vmem:[%s201_s29 + $0x18] sm:$0xff]  ;;  %v231_v13 = vld [vmem:[%s201_s29 + $0x10] sm:$0xff] }
  0x23   : > { %282 = vmatpush.msra.mxu0 %v236_v8  ;;  %551 = vmatpush.msra.mxu1 %v236_v8  ;;  %v230_v14 = vld [vmem:[%s201_s29 + $0x8] sm:$0xff]  ;;  %v229_v15 = vld [vmem:[%s201_s29] sm:$0xff]  ;;  %v223_v16 = vld [vmem:[%s1022_s1 + $0x30] sm:$0xff] }
  0x24   : > { %555 = vmatpush.msra.mxu2 %v235_v9  ;;  %556 = vmatpush.msra.mxu3 %v235_v9  ;;  %v226_v17 = vld [vmem:[%s1022_s1 + $0x48] sm:$0xff]  ;;  %v217_v18 = vld [vmem:[%s1022_s1] sm:$0xff]  ;;  %v220_v19 = vld [vmem:[%s1022_s1 + $0x18] sm:$0xff] }
  0x25   : > { %283 = vmatpush.msra.mxu0 %v235_v9  ;;  %554 = vmatpush.msra.mxu1 %v235_v9  ;;  %v224_v20 = vld [vmem:[%s1022_s1 + $0x38] sm:$0xff]  ;;  %v227_v21 = vld [vmem:[%s1022_s1 + $0x50] sm:$0xff]  ;;  %v218_v22 = vld [vmem:[%s1022_s1 + $0x8] sm:$0xff] }
  0x26   : > { %558 = vmatpush.msra.mxu2 %v234_v10  ;;  %559 = vmatpush.msra.mxu3 %v234_v10  ;;  %v221_v23 = vld [vmem:[%s1022_s1 + $0x20] sm:$0xff]  ;;  %v228_v25 = vld [vmem:[%s1022_s1 + $0x58] sm:$0xff]  ;;  %v219_v26 = vld [vmem:[%s1022_s1 + $0x10] sm:$0xff] }
  0x27   : > { %284 = vmatpush.msra.mxu0 %v234_v10  ;;  %557 = vmatpush.msra.mxu1 %v234_v10  ;;  %v225_v24 = vld [vmem:[%s1022_s1 + $0x40] sm:$0xff]  ;;  %v222_v27 = vld [vmem:[%s1022_s1 + $0x28] sm:$0xff] }
  0x28   : > { %561 = vmatpush.msra.mxu2 %v233_v11  ;;  %562 = vmatpush.msra.mxu3 %v233_v11 }
  0x29   : > { %285 = vmatpush.msra.mxu0 %v233_v11  ;;  %560 = vmatpush.msra.mxu1 %v233_v11 }
  0x2a   : > { %564 = vmatpush.msra.mxu2 %v232_v12  ;;  %565 = vmatpush.msra.mxu3 %v232_v12 }
  0x2b   : > { %286 = vmatpush.msra.mxu0 %v232_v12  ;;  %563 = vmatpush.msra.mxu1 %v232_v12 }
  0x2c   : > { %567 = vmatpush.msra.mxu2 %v231_v13  ;;  %568 = vmatpush.msra.mxu3 %v231_v13 }
  0x2d   : > { %287 = vmatpush.msra.mxu0 %v231_v13  ;;  %566 = vmatpush.msra.mxu1 %v231_v13 }
  0x2e   : > { %570 = vmatpush.msra.mxu2 %v230_v14  ;;  %571 = vmatpush.msra.mxu3 %v230_v14 }
  0x2f   : > { %288 = vmatpush.msra.mxu0 %v230_v14  ;;  %569 = vmatpush.msra.mxu1 %v230_v14 }
  0x30   : > { %573 = vmatpush.msra.mxu2 %v229_v15  ;;  %574 = vmatpush.msra.mxu3 %v229_v15 }
  0x31   : > { %542 = vmatmul.msk.f32.vlgmr.msra.gmra.mxu2 %vm237_vm0, %v223_v16  ;;  %545 = vmatmul.msk.f32.vlgmr.msra.gmra.mxu3 %vm237_vm0, %v226_v17 }
  0x32   : > { %289 = vmatpush.msra.mxu0 %v229_v15  ;;  %572 = vmatpush.msra.mxu1 %v229_v15 }
  0x33   : > { %536 = vmatmul.msk.f32.vlgmr.msra.gmra.mxu0 %vm237_vm0, %v217_v18  ;;  %539 = vmatmul.msk.f32.vlgmr.msra.gmra.mxu1 %vm237_vm0, %v220_v19 }
  0x39   : > { %543 = vmatmul.msk.f32.gmra.mxu2 %vm237_vm0, %v224_v20  ;;  %546 = vmatmul.msk.f32.gmra.mxu3 %vm237_vm0, %v227_v21 }
  0x3b   : > { %537 = vmatmul.msk.f32.gmra.mxu0 %vm237_vm0, %v218_v22  ;;  %540 = vmatmul.msk.f32.gmra.mxu1 %vm237_vm0, %v221_v23 }
  0x41   : > { %544 = vmatmul.msk.f32.gmra.mxu2 %vm237_vm0, %v225_v24  ;;  %547 = vmatmul.msk.f32.gmra.mxu3 %vm237_vm0, %v228_v25 }
  0x43   : > { %538 = vmatmul.msk.f32.gmra.mxu0 %vm237_vm0, %v219_v26  ;;  %541 = vmatmul.msk.f32.gmra.mxu1 %vm237_vm0, %v222_v27 }
  0xb0   : > { %v291_v28 = vpop.f32.mrf.mxu0  ;;  %v300_v29 = vpop.f32.mrf.mxu1 }
  0xb4   : > { %v730_v30 = vpop.f32.mrf.mxu2  ;;  %v732_v31 = vpop.f32.mrf.mxu3 }
  0xb8   : > { %v294_v32 = vpop.f32.mrf.mxu0  ;;  %v303_v33 = vpop.f32.mrf.mxu1 }
  0xbc   : > { %v312_v34 = vpop.f32.mrf.mxu2  ;;  %v734_v35 = vpop.f32.mrf.mxu3 }
  0xc0   : > { %v297_v36 = vpop.f32.mrf.mxu0  ;;  %v306_v37 = vpop.f32.mrf.mxu1  ;;  %330 = sbr.rel (%p548_p8) target bundleno = 222 (0xde), region = 70 }
  0xc4   : > { %v315_v38 = vpop.f32.mrf.mxu2  ;;  %v324_v39 = vpop.f32.mrf.mxu3 }
  0xc5   : > { %vm331_vm1 = vcmask 7168   ;;  %v624_v40 = vmov 0.0  }
  0xc6   : > { %332 = vst.msk [vmem:[%s1023_s2] sm:$0xff] %vm331_vm1, %v624_v40 }
  0xc7   : > { %333 = vst.msk [vmem:[%s1023_s2 + $0x8] sm:$0xff] %vm331_vm1, %v624_v40 }
  0xc8   : > { %334 = vst.msk [vmem:[%s1023_s2 + $0x10] sm:$0xff] %vm331_vm1, %v624_v40 }
  0xc9   : > { %335 = vst.msk [vmem:[%s1023_s2 + $0x18] sm:$0xff] %vm331_vm1, %v624_v40 }
  0xca   : > { %336 = vst.msk [vmem:[%s1023_s2 + $0x20] sm:$0xff] %vm331_vm1, %v624_v40 }
  0xcb   : > { %337 = vst.msk [vmem:[%s1023_s2 + $0x28] sm:$0xff] %vm331_vm1, %v624_v40 }
  0xcc   : > { %338 = vst.msk [vmem:[%s1023_s2 + $0x30] sm:$0xff] %vm331_vm1, %v624_v40 }
  0xcd   : > { %339 = vst.msk [vmem:[%s1023_s2 + $0x38] sm:$0xff] %vm331_vm1, %v624_v40 }
  0xce   : > { %340 = vst.msk [vmem:[%s1023_s2 + $0x40] sm:$0xff] %vm331_vm1, %v624_v40 }
  0xcf   : > { %341 = vst.msk [vmem:[%s1023_s2 + $0x48] sm:$0xff] %vm331_vm1, %v624_v40 }
  0xd0   : > { %342 = vst.msk [vmem:[%s1023_s2 + $0x50] sm:$0xff] %vm331_vm1, %v624_v40 }
  0xd1   : > { %343 = vst.msk [vmem:[%s1023_s2 + $0x58] sm:$0xff] %vm331_vm1, %v624_v40 }
  0xd2   : > { %344 = vst.msk [vmem:[%s1024_s3] sm:$0xff] %vm331_vm1, %v624_v40 }
  0xd3   : > { %345 = vst.msk [vmem:[%s1024_s3 + $0x8] sm:$0xff] %vm331_vm1, %v624_v40 }
  0xd4   : > { %346 = vst.msk [vmem:[%s1024_s3 + $0x10] sm:$0xff] %vm331_vm1, %v624_v40 }
  0xd5   : > { %347 = vst.msk [vmem:[%s1024_s3 + $0x18] sm:$0xff] %vm331_vm1, %v624_v40 }
  0xd6   : > { %348 = vst.msk [vmem:[%s1024_s3 + $0x20] sm:$0xff] %vm331_vm1, %v624_v40 }
  0xd7   : > { %349 = vst.msk [vmem:[%s1024_s3 + $0x28] sm:$0xff] %vm331_vm1, %v624_v40 }
  0xd8   : > { %350 = vst.msk [vmem:[%s1024_s3 + $0x30] sm:$0xff] %vm331_vm1, %v624_v40 }
  0xd9   : > { %351 = vst.msk [vmem:[%s1024_s3 + $0x38] sm:$0xff] %vm331_vm1, %v624_v40 }
  0xda   : > { %352 = vst.msk [vmem:[%s1024_s3 + $0x40] sm:$0xff] %vm331_vm1, %v624_v40 }
  0xdb   : > { %353 = vst.msk [vmem:[%s1024_s3 + $0x48] sm:$0xff] %vm331_vm1, %v624_v40 }
  0xdc   : > { %354 = vst.msk [vmem:[%s1024_s3 + $0x50] sm:$0xff] %vm331_vm1, %v624_v40 }
  0xdd   : > { %355 = vst.msk [vmem:[%s1024_s3 + $0x58] sm:$0xff] %vm331_vm1, %v624_v40 }
  0xde PF: > { %376 = vadd.xlane.f32.xlu2 %v303_v33  ;;  %372 = vadd.xlane.f32.xlu1 %v297_v36  ;;  %v431_v41 = vmul.f32 %v297_v36, %v297_v36  ;;  %v430_v42 = vmul.f32 %v294_v32, %v294_v32  ;;  %v429_v43 = vmul.f32 %v291_v28, %v291_v28  ;;  %v360_v53 = vld [vmem:[%s1023_s2 + $0x20] sm:$0xff]  ;;  %v358_v54 = vld [vmem:[%s1023_s2 + $0x10] sm:$0xff]  ;;  %vm404_vm2 = vcmask 7168   ;;  %v361_v62 = vld [vmem:[%s1023_s2 + $0x28] sm:$0xff] }
  0xdf   : > { %368 = vadd.xlane.f32.xlu0 %v291_v28  ;;  %v434_v44 = vmul.f32 %v306_v37, %v306_v37  ;;  %v433_v45 = vmul.f32 %v303_v33, %v303_v33  ;;  %v432_v46 = vmul.f32 %v300_v29, %v300_v29  ;;  %v437_v47 = vmul.f32 %v315_v38, %v315_v38  ;;  %v356_v55 = vld [vmem:[%s1023_s2] sm:$0xff]  ;;  %v359_v63 = vld [vmem:[%s1023_s2 + $0x18] sm:$0xff]  ;;  %v357_v0 = vld [vmem:[%s1023_s2 + $0x8] sm:$0xff] }
  0xe0   : > { %v436_v48 = vmul.f32 %v312_v34, %v312_v34  ;;  %v435_v49 = vmul.f32 %v730_v30, %v730_v30  ;;  %v440_v50 = vmul.f32 %v324_v39, %v324_v39  ;;  %v439_v51 = vmul.f32 %v734_v35, %v734_v35  ;;  %v364_v7 = vld [vmem:[%s1023_s2 + $0x40] sm:$0xff]  ;;  %v363_v8 = vld [vmem:[%s1023_s2 + $0x38] sm:$0xff]  ;;  %v362_v9 = vld [vmem:[%s1023_s2 + $0x30] sm:$0xff] }
  0xe1   : > { %v438_v52 = vmul.f32 %v732_v31, %v732_v31  ;;  %v367_v16 = vld [vmem:[%s1023_s2 + $0x58] sm:$0xff]  ;;  %v366_v17 = vld [vmem:[%s1023_s2 + $0x50] sm:$0xff]  ;;  %v365_v18 = vld [vmem:[%s1023_s2 + $0x48] sm:$0xff] }
  0xe2   : > { %v419_v25 = vld [vmem:[%s1024_s3 + $0x10] sm:$0xff]  ;;  %v418_v26 = vld [vmem:[%s1024_s3 + $0x8] sm:$0xff]  ;;  %v417_v27 = vld [vmem:[%s1024_s3] sm:$0xff] }
  0xe3   : > { %v420_v36 = vld [vmem:[%s1024_s3 + $0x18] sm:$0xff] }
  0xe6   : > { %378 = vadd.xlane.f32.xlu2 %v306_v37  ;;  %374 = vadd.xlane.f32.xlu1 %v300_v29 }
  0xe7   : > { %370 = vadd.xlane.f32.xlu0 %v294_v32 }
  0xee   : > { %384 = vadd.xlane.f32.xlu2 %v315_v38  ;;  %382 = vadd.xlane.f32.xlu1 %v312_v34  ;;  %v422_v34 = vld [vmem:[%s1024_s3 + $0x28] sm:$0xff] }
  0xef   : > { %380 = vadd.xlane.f32.xlu0 %v730_v30 }
  0xf6   : > { %390 = vadd.xlane.f32.xlu2 %v324_v39  ;;  %388 = vadd.xlane.f32.xlu1 %v734_v35  ;;  %v421_v35 = vld [vmem:[%s1024_s3 + $0x20] sm:$0xff] }
  0xf7   : > { %386 = vadd.xlane.f32.xlu0 %v732_v31 }
  0xfe   : > { %445 = vadd.xlane.f32.xlu2 %v431_v41  ;;  %443 = vadd.xlane.f32.xlu1 %v430_v42 }
  0xff   : > { %441 = vadd.xlane.f32.xlu0 %v429_v43  ;;  %v425_v43 = vld [vmem:[%s1024_s3 + $0x40] sm:$0xff] }
 0x106   : > { %451 = vadd.xlane.f32.xlu2 %v434_v44  ;;  %449 = vadd.xlane.f32.xlu1 %v433_v45  ;;  %v424_v44 = vld [vmem:[%s1024_s3 + $0x38] sm:$0xff]  ;;  %v423_v45 = vld [vmem:[%s1024_s3 + $0x30] sm:$0xff] }
 0x107   : > { %447 = vadd.xlane.f32.xlu0 %v432_v46 }
 0x10e   : > { %457 = vadd.xlane.f32.xlu2 %v437_v47  ;;  %455 = vadd.xlane.f32.xlu1 %v436_v48 }
 0x10f   : > { %453 = vadd.xlane.f32.xlu0 %v435_v49 }
 0x116   : > { %463 = vadd.xlane.f32.xlu2 %v440_v50  ;;  %461 = vadd.xlane.f32.xlu1 %v439_v51 }
 0x117   : > { %459 = vadd.xlane.f32.xlu0 %v438_v52  ;;  %v428_v52 = vld [vmem:[%s1024_s3 + $0x58] sm:$0xff] }
 0x151   : > { %v377_v56 = vpop.xlane.xlu2 %376  ;;  %v373_v57 = vpop.xlane.xlu1 %372 }
 0x152   : > { %v396_v58 = vadd.f32 %v377_v56, %v360_v53  ;;  %v394_v59 = vadd.f32 %v373_v57, %v358_v54  ;;  %v369_v60 = vpop.xlane.xlu0 %368  ;;  %v427_v53 = vld [vmem:[%s1024_s3 + $0x50] sm:$0xff]  ;;  %v426_v54 = vld [vmem:[%s1024_s3 + $0x48] sm:$0xff] }
 0x153   : > { %v392_v61 = vadd.f32 %v369_v60, %v356_v55 }
 0x154   : > { %409 = vst.msk [vmem:[%s1023_s2 + $0x20] sm:$0xff] %vm404_vm2, %v396_v58 }
 0x155   : > { %407 = vst.msk [vmem:[%s1023_s2 + $0x10] sm:$0xff] %vm404_vm2, %v394_v59 }
 0x156   : > { %405 = vst.msk [vmem:[%s1023_s2] sm:$0xff] %vm404_vm2, %v392_v61 }
 0x159   : > { %v379_v1 = vpop.xlane.xlu2 %378  ;;  %v375_v2 = vpop.xlane.xlu1 %374 }
 0x15a   : > { %v397_v3 = vadd.f32 %v379_v1, %v361_v62  ;;  %v395_v4 = vadd.f32 %v375_v2, %v359_v63  ;;  %v371_v5 = vpop.xlane.xlu0 %370 }
 0x15b   : > { %v393_v6 = vadd.f32 %v371_v5, %v357_v0 }
 0x15c   : > { %410 = vst.msk [vmem:[%s1023_s2 + $0x28] sm:$0xff] %vm404_vm2, %v397_v3 }
 0x15d   : > { %408 = vst.msk [vmem:[%s1023_s2 + $0x18] sm:$0xff] %vm404_vm2, %v395_v4 }
 0x15e   : > { %406 = vst.msk [vmem:[%s1023_s2 + $0x8] sm:$0xff] %vm404_vm2, %v393_v6 }
 0x161   : > { %v385_v10 = vpop.xlane.xlu2 %384  ;;  %v383_v11 = vpop.xlane.xlu1 %382 }
 0x162   : > { %v400_v12 = vadd.f32 %v385_v10, %v364_v7  ;;  %v399_v13 = vadd.f32 %v383_v11, %v363_v8  ;;  %v381_v14 = vpop.xlane.xlu0 %380 }
 0x163   : > { %v398_v15 = vadd.f32 %v381_v14, %v362_v9 }
 0x164   : > { %413 = vst.msk [vmem:[%s1023_s2 + $0x40] sm:$0xff] %vm404_vm2, %v400_v12 }
 0x165   : > { %412 = vst.msk [vmem:[%s1023_s2 + $0x38] sm:$0xff] %vm404_vm2, %v399_v13 }
 0x166   : > { %411 = vst.msk [vmem:[%s1023_s2 + $0x30] sm:$0xff] %vm404_vm2, %v398_v15 }
 0x169   : > { %v391_v19 = vpop.xlane.xlu2 %390  ;;  %v389_v20 = vpop.xlane.xlu1 %388 }
 0x16a   : > { %v403_v21 = vadd.f32 %v391_v19, %v367_v16  ;;  %v402_v22 = vadd.f32 %v389_v20, %v366_v17  ;;  %v387_v23 = vpop.xlane.xlu0 %386 }
 0x16b   : > { %v401_v24 = vadd.f32 %v387_v23, %v365_v18 }
 0x16c   : > { %416 = vst.msk [vmem:[%s1023_s2 + $0x58] sm:$0xff] %vm404_vm2, %v403_v21 }
 0x16d   : > { %415 = vst.msk [vmem:[%s1023_s2 + $0x50] sm:$0xff] %vm404_vm2, %v402_v22 }
 0x16e   : > { %414 = vst.msk [vmem:[%s1023_s2 + $0x48] sm:$0xff] %vm404_vm2, %v401_v24 }
 0x171   : > { %v446_v28 = vpop.xlane.xlu2 %445  ;;  %v444_v29 = vpop.xlane.xlu1 %443 }
 0x172   : > { %v467_v30 = vadd.f32 %v446_v28, %v419_v25  ;;  %v466_v31 = vadd.f32 %v444_v29, %v418_v26  ;;  %v442_v32 = vpop.xlane.xlu0 %441 }
 0x173   : > { %v465_v33 = vadd.f32 %v442_v32, %v417_v27 }
 0x174   : > { %479 = vst.msk [vmem:[%s1024_s3 + $0x10] sm:$0xff] %vm404_vm2, %v467_v30 }
 0x175   : > { %478 = vst.msk [vmem:[%s1024_s3 + $0x8] sm:$0xff] %vm404_vm2, %v466_v31 }
 0x176   : > { %477 = vst.msk [vmem:[%s1024_s3] sm:$0xff] %vm404_vm2, %v465_v33 }
 0x179   : > { %v452_v37 = vpop.xlane.xlu2 %451  ;;  %v450_v38 = vpop.xlane.xlu1 %449 }
 0x17a   : > { %v470_v39 = vadd.f32 %v452_v37, %v422_v34  ;;  %v469_v40 = vadd.f32 %v450_v38, %v421_v35  ;;  %v448_v41 = vpop.xlane.xlu0 %447 }
 0x17b   : > { %v468_v42 = vadd.f32 %v448_v41, %v420_v36 }
 0x17c   : > { %482 = vst.msk [vmem:[%s1024_s3 + $0x28] sm:$0xff] %vm404_vm2, %v470_v39 }
 0x17d   : > { %481 = vst.msk [vmem:[%s1024_s3 + $0x20] sm:$0xff] %vm404_vm2, %v469_v40 }
 0x17e   : > { %480 = vst.msk [vmem:[%s1024_s3 + $0x18] sm:$0xff] %vm404_vm2, %v468_v42 }
 0x181   : > { %v458_v46 = vpop.xlane.xlu2 %457  ;;  %v456_v47 = vpop.xlane.xlu1 %455 }
 0x182   : > { %v473_v48 = vadd.f32 %v458_v46, %v425_v43  ;;  %v472_v49 = vadd.f32 %v456_v47, %v424_v44  ;;  %v454_v50 = vpop.xlane.xlu0 %453 }
 0x183   : > { %v471_v51 = vadd.f32 %v454_v50, %v423_v45 }
 0x184   : > { %485 = vst.msk [vmem:[%s1024_s3 + $0x40] sm:$0xff] %vm404_vm2, %v473_v48 }
 0x185   : > { %484 = vst.msk [vmem:[%s1024_s3 + $0x38] sm:$0xff] %vm404_vm2, %v472_v49 }
 0x186   : > { %483 = vst.msk [vmem:[%s1024_s3 + $0x30] sm:$0xff] %vm404_vm2, %v471_v51 }
 0x189   : > { %v464_v55 = vpop.xlane.xlu2 %463  ;;  %v462_v56 = vpop.xlane.xlu1 %461 }
 0x18a   : > { %v476_v57 = vadd.f32 %v464_v55, %v428_v52  ;;  %v475_v58 = vadd.f32 %v462_v56, %v427_v53  ;;  %v460_v59 = vpop.xlane.xlu0 %459 }
 0x18b   : > { %v474_v60 = vadd.f32 %v460_v59, %v426_v54 }
 0x18c   : > { %488 = vst.msk [vmem:[%s1024_s3 + $0x58] sm:$0xff] %vm404_vm2, %v476_v57 }
 0x18d   : > { %487 = vst.msk [vmem:[%s1024_s3 + $0x50] sm:$0xff] %vm404_vm2, %v475_v58 }
 0x18e   : > { %486 = vst.msk [vmem:[%s1024_s3 + $0x48] sm:$0xff] %vm404_vm2, %v474_v60 }
 0x18f PF: > { %p11_p9 = scmp.ge.s32.totalorder %s662_s16, 4   ;;  %s1025_s12 = smov %s618_s13 }
 0x190   : > { %s1026_s13 = smov %s671_s19  ;;  %s1027_s14 = smov %s662_s16 }
 0x191   :  { %13 = sbr.rel (!%p11_p9) target bundleno = 2 (0x2), region = 109 }

</bundles_post_ra>
